<compile_context>
chip_gen: v5e
topology: v5e:2x2
jax: 0.10.0
libtpu: 0.0.40
codegen_flags: <defaults>
</compile_context>

<pallas_src>
import math
from functools import partial

import jax
import jax.numpy as jnp
from jax.experimental import pallas as pl
from jax.experimental.pallas import tpu as pltpu

_LANE = 128
_SUBLANE = 8
_VMEM_BLOCK_BUDGET = 36 * 1024 * 1024   # bytes of live (double-buffered) blocks
_VMEM_LIMIT_BYTES = 48 * 1024 * 1024    # scoped VMEM limit (headroom on 64 MiB v7x)


def _round_up(x, m):
    return (x + m - 1) // m * m


def _decoder_out_kernel(h_ref, w2_ref, b2_ref, o_ref):
    """One (batch_tile, out_tile) step of  out = sigmoid(h @ W2 + b2)."""
    y = jnp.dot(h_ref[...], w2_ref[...], preferred_element_type=jnp.float32)
    y = y + b2_ref[...]                                    # f32 bias add (VPU)
    # TODO(synk): on v5e an explicit jnp.exp + pl.reciprocal(approx=True) keeps
    # the divide off the VALU; exact sigmoid kept here for reference fidelity
    # (the epilogue is hidden under the W2/output DMA either way).
    o_ref[...] = jax.nn.sigmoid(y).astype(o_ref.dtype)


def prepare_decoder_params(w1, b1, w2, b2):
    """One-time weight prep: pad out_dim to a lane multiple, cast to bf16.

    Call once at parameter-load time, NOT per forward: re-padding / re-casting
    W2 every call would re-stream the entire f32 W2 through HBM.
    """
    hidden, out_dim = w2.shape
    np_pad = _round_up(out_dim, _LANE)
    w1_b = w1.astype(jnp.bfloat16)
    b1_f = b1.astype(jnp.float32).reshape(1, -1)
    w2_b = jnp.pad(w2, ((0, 0), (0, np_pad - out_dim))).astype(jnp.bfloat16)
    b2_f = jnp.pad(b2, (0, np_pad - out_dim)).astype(jnp.float32).reshape(1, np_pad)
    return (w1_b, b1_f, w2_b, b2_f)


def reconstruction_head(mean, params, im_dims, *, tile_b=None, tile_n=None,
                        out_dtype=jnp.float32):
    """Pallas implementation of ReconstructionHead.forward.

    mean:   (B, latent_dim) float32 == lcmvae_outputs['mean']
    params: output of prepare_decoder_params(w1, b1, w2, b2)
    returns (B, *im_dims) in out_dtype (like PyTorch's out.view(-1, *im_dims))
    """
    w1_b, b1_f, w2_b, b2_f = params
    B, _latent = mean.shape
    hidden, Np = w2_b.shape
    out_dim = math.prod(im_dims)
    assert Np == _round_up(out_dim, _LANE), (Np, out_dim)

    # ---- layer 1 (tiny GEMM) hoisted out of the streaming kernel -----------
    h = jnp.dot(mean.astype(jnp.bfloat16), w1_b,
                preferred_element_type=jnp.float32)
    h = jnp.maximum(h + b1_f, 0.0).astype(jnp.bfloat16)    # bf16 feed to MXU

    # ---- tile selection -----------------------------------------------------
    if tile_b is None:
        # Whole batch in one tile when feasible -> W2 streamed from HBM once.
        tile_b = _round_up(B, _SUBLANE) if B <= 512 else 256
    tile_b = max(_SUBLANE, min(_round_up(tile_b, _SUBLANE), _round_up(B, _SUBLANE)))
    grid_b = pl.cdiv(B, tile_b)

    out_itemsize = jnp.dtype(out_dtype).itemsize
    if tile_n is None:
        # Double-buffered block footprint: h + W2 + b2 + out  <= budget.
        fixed = 2 * tile_b * hidden * 2                              # h (bf16)
        per_col = 2 * (hidden * 2 + tile_b * out_itemsize + _SUBLANE * 4)
        tile_n = (_VMEM_BLOCK_BUDGET - fixed) // per_col // _LANE * _LANE
        tile_n = max(_LANE, min(tile_n, 8192))
    tile_n = min(tile_n, Np)
    grid_n = pl.cdiv(Np, tile_n)

    # Pad h rows so every *input* block read is in-bounds (cheap: B x hidden).
    Bp = grid_b * tile_b
    if Bp != B:
        h = jnp.pad(h, ((0, Bp - B), (0, 0)))

    cost = pl.CostEstimate(
        flops=2 * Bp * hidden * Np,
        transcendentals=Bp * Np,
        bytes_accessed=(Bp * hidden * 2 + grid_b * w2_b.size * 2
                        + b2_f.size * 4 + B * Np * out_itemsize),
    )

    flat = pl.pallas_call(
        _decoder_out_kernel,
        # Exactly B rows: the boundary batch block write is masked by Pallas,
        # so there is no post-kernel row-slice copy of the (large) output.
        out_shape=jax.ShapeDtypeStruct((B, Np), out_dtype),
        grid_spec=pltpu.PrefetchScalarGridSpec(
            num_scalar_prefetch=0,
            grid=(grid_b, grid_n),
            in_specs=[
                pl.BlockSpec((tile_b, hidden), lambda i, j: (i, 0)),   # h
                pl.BlockSpec((hidden, tile_n), lambda i, j: (0, j)),   # W2 (streamed)
                pl.BlockSpec((1, tile_n),      lambda i, j: (0, j)),   # b2 (sliced)
            ],
            out_specs=pl.BlockSpec((tile_b, tile_n), lambda i, j: (i, j)),
        ),
        compiler_params=pltpu.CompilerParams(
            # No cross-step carry -> both axes independent (megacore shards N
            # across v7x's two TensorCores without duplicating the W2 stream).
            dimension_semantics=("parallel", "parallel"),
            vmem_limit_bytes=_VMEM_LIMIT_BYTES,
        ),
        cost_estimate=cost,
    )(h, w2_b, b2_f)

    # Column padding only exists when out_dim isn't a multiple of 128
    # (3*224*224 = 150528 is, so this is a no-op for realistic im_dims).
    if Np != out_dim:
        flat = flat[:, :out_dim]
    return flat.reshape(B, *im_dims)


if __name__ == "__main__":
    # Small, shape-consistent example:
    #   batch=2, latent_dim=32, hidden=64, im_dims=(3, 8, 8) -> out_dim=192
    B, LATENT, HIDDEN = 2, 32, 64
    IM_DIMS = (3, 8, 8)
    OUT_DIM = math.prod(IM_DIMS)

    key = jax.random.PRNGKey(0)
    k_mean, k_w1, k_b1, k_w2, k_b2 = jax.random.split(key, 5)

    mean = jax.random.normal(k_mean, (B, LATENT), dtype=jnp.float32)
    # Deterministic synthetic parameters (no checkpoint load).
    w1 = jax.random.normal(k_w1, (LATENT, HIDDEN), dtype=jnp.float32) * 0.05
    b1 = jax.random.normal(k_b1, (HIDDEN,), dtype=jnp.float32) * 0.01
    w2 = jax.random.normal(k_w2, (HIDDEN, OUT_DIM), dtype=jnp.float32) * 0.05
    b2 = jax.random.normal(k_b2, (OUT_DIM,), dtype=jnp.float32) * 0.01

    params = prepare_decoder_params(w1, b1, w2, b2)   # once, at load time
    fwd = jax.jit(partial(reconstruction_head, im_dims=IM_DIMS))
    out = jax.block_until_ready(fwd(mean, params))
    assert out.shape == (B, *IM_DIMS), out.shape

    # Pure-JAX reference with identical bf16 weights / f32 accumulation.
    h_ref = jnp.maximum(
        jnp.dot(mean.astype(jnp.bfloat16), w1.astype(jnp.bfloat16),
                preferred_element_type=jnp.float32) + b1, 0.0).astype(jnp.bfloat16)
    y_ref = jnp.dot(h_ref, w2.astype(jnp.bfloat16),
                    preferred_element_type=jnp.float32) + b2
    ref = jax.nn.sigmoid(y_ref).reshape(B, *IM_DIMS)
    err = float(jnp.max(jnp.abs(out - ref)))
    assert bool(jnp.allclose(out, ref, atol=1e-3, rtol=1e-3)), err

    print("KERNEL_OK")
</pallas_src>

<mosaic_0001>
module attributes {stable_mosaic.version = 11 : i64} {
  func.func @_decoder_out_kernel(%arg0: i32, %arg1: i32, %arg2: memref<8x64xbf16, #tpu.memory_space<vmem>>, %arg3: memref<64x256xbf16, #tpu.memory_space<vmem>>, %arg4: memref<1x256xf32, #tpu.memory_space<vmem>>, %arg5: memref<8x256xf32, #tpu.memory_space<vmem>>) attributes {dimension_semantics = [#tpu.dimension_semantics<parallel>, #tpu.dimension_semantics<parallel>], iteration_bounds = array<i64: 1, 1>, scalar_prefetch = 0 : i64, scratch_operands = 0 : i64, tpu.core_type = #tpu.core_type<tc>, window_params = [{transform_indices = @transform_0, window_bounds = array<i64: 8, 64>}, {transform_indices = @transform_1, window_bounds = array<i64: 64, 256>}, {transform_indices = @transform_2, window_bounds = array<i64: 1, 256>}, {transform_indices = @transform_3, window_bounds = array<i64: 8, 256>}]} {
    %c0 = arith.constant 0 : index
    %c0_0 = arith.constant 0 : index
    %0 = vector.load %arg2[%c0, %c0_0] : memref<8x64xbf16, #tpu.memory_space<vmem>>, vector<8x64xbf16>
    %c0_1 = arith.constant 0 : index
    %c0_2 = arith.constant 0 : index
    %1 = vector.load %arg3[%c0_1, %c0_2] : memref<64x256xbf16, #tpu.memory_space<vmem>>, vector<64x256xbf16>
    %cst = arith.constant dense<0.000000e+00> : vector<8x256xf32>
    %2 = tpu.matmul %0, %1, %cst {dimension_numbers = #tpu.dot_dimension_numbers<[1], [0], [0], [1], [0, 0, 1, 1], [], []>} : vector<8x64xbf16>, vector<64x256xbf16>, vector<8x256xf32> -> vector<8x256xf32>
    %c0_3 = arith.constant 0 : index
    %c0_4 = arith.constant 0 : index
    %3 = vector.load %arg4[%c0_3, %c0_4] : memref<1x256xf32, #tpu.memory_space<vmem>>, vector<1x256xf32>
    %4 = vector.broadcast %3 : vector<1x256xf32> to vector<8x256xf32>
    %5 = arith.addf %2, %4 : vector<8x256xf32>
    %6 = arith.negf %5 : vector<8x256xf32>
    %7 = math.exp %6 : vector<8x256xf32>
    %cst_5 = arith.constant 1.000000e+00 : f32
    %8 = vector.broadcast %cst_5 : f32 to vector<8x256xf32>
    %9 = arith.addf %8, %7 : vector<8x256xf32>
    %10 = arith.divf %8, %9 : vector<8x256xf32>
    %c0_6 = arith.constant 0 : index
    %c0_7 = arith.constant 0 : index
    %11 = vector.load %arg5[%c0_6, %c0_7] : memref<8x256xf32, #tpu.memory_space<vmem>>, vector<8x256xf32>
    tpu.vector_store %arg5[%c0_6, %c0_7], %10 {strides = array<i32>} : memref<8x256xf32, #tpu.memory_space<vmem>>, vector<8x256xf32>,
    return
  }
  func.func @transform_0(%arg0: i32, %arg1: i32) -> (i32, i32) {
    %c0_i32 = arith.constant 0 : i32
    %c0_i32_0 = arith.constant 0 : i32
    return %arg0, %c0_i32 : i32, i32
  }
  func.func @transform_1(%arg0: i32, %arg1: i32) -> (i32, i32) {
    %c0_i32 = arith.constant 0 : i32
    %c0_i32_0 = arith.constant 0 : i32
    return %c0_i32, %arg1 : i32, i32
  }
  func.func @transform_2(%arg0: i32, %arg1: i32) -> (i32, i32) {
    %c0_i32 = arith.constant 0 : i32
    %c0_i32_0 = arith.constant 0 : i32
    return %c0_i32, %arg1 : i32, i32
  }
  func.func @transform_3(%arg0: i32, %arg1: i32) -> (i32, i32) {
    %c0_i32 = arith.constant 0 : i32
    return %arg0, %arg1 : i32, i32
  }
}

</mosaic_0001>

<bundles_post_ra>
// kernel: reconstruction_head.1
= control target key start
LH: loop header
LB: loop body
LE: loop exit
PB: predicated region body
PF: predicated region fallthrough
CT: control target
= control target key end

     0   :  { %8 = vsyncpa [#allocation3], 0  ;;  %s299_s15 = smov [#allocation2]   ;;  %s300_s17 = smov 128   ;;  %s334_s0 = inlined_call_operand.vmem [shape: bf16[8,64], index: 0, kind: input, shape index: {}]   ;;  %s335_s1 = inlined_call_operand.hbm [shape: bf16[64,256], index: 1, kind: input, shape index: {}]   ;;  %s336_s2 = inlined_call_operand.vmem [shape: f32[1,256], index: 2, kind: input, shape index: {}]   ;;  %s337_s3 = inlined_call_operand.vmem [shape: f32[2,256], index: 3, kind: output, shape index: {}]  }
   0x1   :  { %s15_s14 = sshll.u32 %s335_s1, 4  ;;  %s17_s16 = sshll.u32 %s299_s15, 4  ;;  %s16_s14 = int_to_ptr.hbm [resolvable:$true] %s15_s14  ;;  %s18_s16 = int_to_ptr.vmem [resolvable:$true] %s17_s16 }
   0x2   :  { %s301_s18 = smov 8  }
   0x3   :  { %23 = dma.hbm_to_vmem [thread:$0]  %s16_s14, 1024, %s18_s16, [#allocation3], %s300_s17, %s300_s17, %s301_s18  }
   0x4   :  { %297 = dma.done.wait [#allocation3], 1024  }
   0x5   :  { %298 = vsyncadd [#allocation3], 4294966272  ;;  %v244_v0 = vld [vmem:[#allocation2 + $0x30] sm:$0xf]  ;;  %v261_v1 = vld [vmem:[#allocation2 + $0x34] sm:$0xf0] }
   0x6   :  { %v260_v2 = vld [vmem:[#allocation2 + $0x34] sm:$0xf]  ;;  %v245_v3 = vor.u32 %v261_v1, %v244_v0  ;;  %v246_v4 = vld [vmem:[#allocation2 + $0x38] sm:$0xf0]  ;;  %v236_v5 = vld [vmem:[#allocation2 + $0x20] sm:$0xf] }
   0x7   :  { %v259_v6 = vld [vmem:[#allocation2 + $0x24] sm:$0xf0]  ;;  %v249_v7 = vor.u32 %v260_v2, %v246_v4  ;;  %v258_v8 = vld [vmem:[#allocation2 + $0x24] sm:$0xf]  ;;  %v238_v9 = vld [vmem:[#allocation2 + $0x28] sm:$0xf0] }
   0x8   :  { %94 = vmatpush.bf16.msra.mxu0 %v245_v3  ;;  %v237_v10 = vor.u32 %v259_v6, %v236_v5  ;;  %v241_v11 = vor.u32 %v258_v8, %v238_v9  ;;  %v228_v12 = vld [vmem:[#allocation2 + $0x10] sm:$0xf]  ;;  %v257_v13 = vld [vmem:[#allocation2 + $0x14] sm:$0xf0]  ;;  %v256_v14 = vld [vmem:[#allocation2 + $0x14] sm:$0xf] }
   0x9   :  { %107 = vmatpush.bf16.msra.mxu1 %v249_v7  ;;  %v230_v15 = vld [vmem:[#allocation2 + $0x18] sm:$0xf0]  ;;  %v229_v16 = vor.u32 %v257_v13, %v228_v12  ;;  %v220_v18 = vld [vmem:[#allocation2] sm:$0xf]  ;;  %v255_v19 = vld [vmem:[#allocation2 + $0x4] sm:$0xf0] }
   0xa   :  { %v233_v17 = vor.u32 %v256_v14, %v230_v15  ;;  %v254_v20 = vld [vmem:[#allocation2 + $0x4] sm:$0xf]  ;;  %v222_v21 = vld [vmem:[#allocation2 + $0x8] sm:$0xf0]  ;;  %v221_v22 = vor.u32 %v255_v19, %v220_v18  ;;  %v31_v24 = vld [vmem:[%s334_s0] sm:$0xf] }
   0xb   :  { %v225_v23 = vor.u32 %v254_v20, %v222_v21  ;;  %vm86_vm0 = vcmask 523264   ;;  %v40_v25 = vld [vmem:[%s336_s2] sm:$0x3]  ;;  %vm157_vm7 = vcmask 1041408  }
   0xc   :  { %95 = vmatpush.bf16.msra.mxu0 %v237_v10  ;;  %v42_v26 = vperm.slane %v40_v25, 0  ;;  %v43_v27 = vperm.slane %v40_v25, 1 }
   0xd   :  { %108 = vmatpush.bf16.msra.mxu1 %v241_v11 }
  0x10   :  { %96 = vmatpush.bf16.msra.mxu0 %v229_v16 }
  0x11   :  { %109 = vmatpush.bf16.msra.mxu1 %v233_v17 }
  0x14   :  { %97 = vmatpush.bf16.msra.mxu0 %v221_v22 }
  0x15   :  { %110 = vmatpush.bf16.msra.mxu1 %v225_v23 }
  0x17   :  { %250 = vmatmul.msk.bf16.vlgmr.msra.gmra.mxu0 %vm86_vm0, %v31_v24 }
  0x18   :  { %251 = vmatmul.msk.bf16.vlgmr.msra.gmra.mxu1 %vm86_vm0, %v31_v24 }
  0x94   :  { %v99_v28 = vpop.f32.mrf.mxu0 }
  0x95   :  { %v100_v29 = vadd.f32 %v99_v28, %v42_v26  ;;  %v112_v30 = vpop.f32.mrf.mxu1 }
  0x96   :  { %v113_v31 = vadd.f32 %v112_v30, %v43_v27 }
  0x97   :  { %v252_v32 = vmul.f32 -1.442695, %v100_v29 }
  0x98   :  { %v253_v33 = vmul.f32 -1.442695, %v113_v31 }
  0x99   :  { %265 = vpow2.f32 %v252_v32 }
  0x9a   :  { %267 = vpow2.f32 %v253_v33 }
  0x9c   :  { %v101_v34 = vpop.f32.mrf.mxu0 }
  0x9d   :  { %v114_v35 = vpop.f32.mrf.mxu1 }
  0x9f   :  { %v266_v36 = vpop.eup %265 }
  0xa0   :  { %v268_v37 = vpop.eup %267  ;;  %v122_v38 = vadd.f32 1.0, %v266_v36 }
  0xa1   :  { %v123_v39 = vadd.f32 1.0, %v268_v37 }
  0xa2   :  { %269 = vrcp.f32 %v122_v38  ;;  %vm129_vm3 = vweird.f32 %v122_v38  ;;  %v135_v51 = vand.u32 2147483648, %v122_v38  ;;  %v133_v52 = vand.u32 2147483647, %v122_v38 }
  0xa3   :  { %271 = vrcp.f32 %v123_v39  ;;  %v150_v47 = vand.u32 2147483648, %v123_v39  ;;  %v148_v49 = vand.u32 2147483647, %v123_v39  ;;  %vm144_vm5 = vweird.f32 %v123_v39 }
  0xa4   :  { %v136_v57 = vor.u32 1.1754944e-38, %v135_v51  ;;  %vm134_vm9 = vcmp.eq.f32.partialorder %v133_v52, 8.507059e+37 }
  0xa5   :  { %v151_v54 = vor.u32 1.1754944e-38, %v150_v47  ;;  %vm149_vm8 = vcmp.eq.f32.partialorder %v148_v49, 8.507059e+37 }
  0xa8   :  { %v270_v40 = vpop.eup %269 }
  0xa9   :  { %v272_v41 = vpop.eup %271  ;;  %v125_v42 = vmul.f32 %v270_v40, %v122_v38  ;;  %vm130_vm1 = vweird.f32 %v270_v40 }
  0xaa   :  { %v140_v43 = vmul.f32 %v272_v41, %v123_v39  ;;  %vm145_vm2 = vweird.f32 %v272_v41  ;;  %vm131_vm4 = vmor %vm129_vm3, %vm130_vm1 }
  0xab   :  { %v126_v44 = vsub.f32 1.0, %v125_v42  ;;  %vm146_vm6 = vmor %vm144_vm5, %vm145_vm2 }
  0xac   :  { %v141_v45 = vsub.f32 1.0, %v140_v43 }
  0xad   :  { %v127_v46 = vmul.f32 %v270_v40, %v126_v44 }
  0xae   :  { %v142_v48 = vmul.f32 %v272_v41, %v141_v45 }
  0xaf   :  { %v128_v50 = vadd.f32 %v270_v40, %v127_v46 }
  0xb0   :  { %v143_v53 = vadd.f32 %v272_v41, %v142_v48 }
  0xb1   :  { %v132_v55 = vsel %vm131_vm4, %v270_v40, %v128_v50 }
  0xb2   :  { %v147_v56 = vsel %vm146_vm6, %v272_v41, %v143_v53  ;;  %v137_v60 = vsel %vm134_vm9, %v136_v57, %v132_v55 }
  0xb3   :  { %v152_v58 = vsel %vm149_vm8, %v151_v54, %v147_v56 }
  0xb4   :  { %v156_v59 = vrot.slane %v152_v58, 6 }
  0xb6   :  { %v158_v61 = vsel %vm157_vm7, %v137_v60, %v156_v59 }
  0xb7   :  { %172 = vst [vmem:[#allocation4] sm:$0xf] %v158_v61 }
  0xbe   :  { %v194_v62 = vld [vmem:[#allocation4] sm:$0xf] }
  0xbf   :  { %195 = vst [vmem:[%s337_s3] sm:$0xf] %v194_v62 }
  0xc0   :  { %213 = vsyncpa [#allocation3], 1 }

</bundles_post_ra>
